<compile_context>
chip_gen: v5e
topology: v5e:2x2
jax: 0.10.0
libtpu: 0.0.40
codegen_flags: <defaults>
</compile_context>

<pallas_src>
import jax
import jax.numpy as jnp
from jax.experimental import pallas as pl
from jax.experimental.pallas import tpu as pltpu


def linear_kernel(params_ref, xt_ref, o_ref):
    # params_ref: SMEM f32[3] = [w00, w01, b]   (scalar path, no VMEM tiles)
    # xt_ref:     VMEM (2, TR, C)  feature-major activation block
    # o_ref:      VMEM (TR, C)     dense output block
    w0 = params_ref[0]
    w1 = params_ref[1]
    b = params_ref[2]
    x0 = xt_ref[0].astype(jnp.float32)      # (TR, C)
    x1 = xt_ref[1].astype(jnp.float32)      # (TR, C)
    # Two scalar*vector multiply-adds + bias on the VPU; no MXU, no transposes.
    o_ref[...] = (x0 * w0 + x1 * w1 + b).astype(o_ref.dtype)


def _choose_tiling(batch):
    """Pick (C lanes, TR rows-per-block, N grid steps).

    Targets ~4 MiB f32 input blocks (2*TR*C*4 bytes) so the kernel is
    HBM-bandwidth-bound rather than per-step-overhead-bound, while the
    double-buffered (input + output) footprint stays ~12 MiB -- comfortably
    inside v7x's 64 MiB VMEM as well as v5e/v6e's 128 MiB.
    """
    C = 512                                # lane axis: multiple of 128
    rows = pl.cdiv(batch, C)               # sublane-axis rows needed
    TR_MAX = 1024                          # 4 MiB input / 2 MiB output block
    n = max(1, pl.cdiv(rows, TR_MAX))
    if n == 1 and rows >= 256:
        n = 2                              # >=2 steps: both v7x TCs get work
    tr = pl.cdiv(rows, n)
    tr = max(8, ((tr + 7) // 8) * 8)       # sublane-dense: multiple of 8
    return C, tr, n


def linear_forward_feature_major(xt, weight, bias):
    """nn.Linear(2, 1) forward on feature-major activations.

    xt:     (2, batch)  -- preferred producer layout (no transpose pass)
    weight: (1, 2), bias: (1,)
    returns (batch, 1)
    """
    two, batch = xt.shape
    assert two == 2 and weight.shape == (1, 2) and bias.shape == (1,)
    out_dtype = xt.dtype

    # Three scalar parameters on the scalar (SMEM) path: [w00, w01, b].
    params = jnp.concatenate(
        [weight.reshape(-1), bias.reshape(-1)]
    ).astype(jnp.float32)

    C, tr, n = _choose_tiling(batch)
    padded = n * tr * C
    if padded != batch:
        xt = jnp.pad(xt, ((0, 0), (0, padded - batch)))
    # Free row-major reshape: batch axis -> (rows, lanes); fully dense tiles.
    x3 = xt.reshape(2, n * tr, C)

    in_block_bytes = 2 * tr * C * x3.dtype.itemsize
    out_block_bytes = tr * C * out_dtype.itemsize
    # double-buffered blocks + generous headroom for internal scratch
    vmem_limit = max(2 * (in_block_bytes + out_block_bytes) + (8 << 20),
                     16 << 20)

    out2 = pl.pallas_call(
        linear_kernel,
        out_shape=jax.ShapeDtypeStruct((n * tr, C), out_dtype),
        grid=(n,),
        in_specs=[
            # Whole parameter vector in SMEM; no tiling, no per-step DMA.
            pl.BlockSpec(memory_space=pltpu.MemorySpace.SMEM),
            pl.BlockSpec((2, tr, C), lambda i: (0, i, 0)),
        ],
        out_specs=pl.BlockSpec((tr, C), lambda i: (i, 0)),
        compiler_params=pltpu.CompilerParams(
            dimension_semantics=("parallel",),  # batch axis: megacore-shardable
            vmem_limit_bytes=int(vmem_limit),
        ),
    )(params, x3)

    y = out2.reshape(-1)
    if padded != batch:
        y = y[:batch]
    return y.reshape(batch, 1)


def linear_forward(x, weight, bias):
    """Pallas equivalent of torch.nn.Linear(2, 1).forward(x) for x=(batch, 2)."""
    batch, in_features = x.shape
    assert in_features == 2
    # NOTE: x.T is a real HBM transpose copy (one extra read+write pass over
    # x), not free.  Producers that can supply feature-major activations
    # should call linear_forward_feature_major directly to avoid it.
    return linear_forward_feature_major(x.T, weight, bias)


if __name__ == "__main__":
    IN_FEATURES = 2
    OUT_FEATURES = 1
    BATCH = 8

    key = jax.random.PRNGKey(0)
    k_x, k_w, k_b = jax.random.split(key, 3)

    # Deterministic PyTorch-style init: uniform(-1/sqrt(in), 1/sqrt(in)).
    bound = 1.0 / jnp.sqrt(jnp.float32(IN_FEATURES))
    weight = jax.random.uniform(
        k_w, (OUT_FEATURES, IN_FEATURES), jnp.float32, -bound, bound
    )
    bias = jax.random.uniform(k_b, (OUT_FEATURES,), jnp.float32, -bound, bound)

    x = jax.random.normal(k_x, (BATCH, IN_FEATURES), jnp.float32)

    out = linear_forward(x, weight, bias)
    out = jax.block_until_ready(out)

    # Reference check against plain JAX (same semantics as nn.Linear).
    ref = x @ weight.T + bias
    assert out.shape == (BATCH, OUT_FEATURES)
    assert jnp.allclose(out, ref, atol=1e-5, rtol=1e-5)

    print("KERNEL_OK")
</pallas_src>

<mosaic_0001>
module attributes {stable_mosaic.version = 11 : i64} {
  func.func @linear_kernel(%arg0: i32, %arg1: memref<3xf32, #tpu.memory_space<smem>>, %arg2: memref<2x8x512xf32, #tpu.memory_space<vmem>>, %arg3: memref<8x512xf32, #tpu.memory_space<vmem>>) attributes {dimension_semantics = [#tpu.dimension_semantics<parallel>], iteration_bounds = array<i64: 1>, scalar_prefetch = 0 : i64, scratch_operands = 0 : i64, tpu.core_type = #tpu.core_type<tc>, window_params = [{transform_indices = @transform_0, window_bounds = array<i64: 3>}, {transform_indices = @transform_1, window_bounds = array<i64: 2, 8, 512>}, {transform_indices = @transform_2, window_bounds = array<i64: 8, 512>}]} {
    %c0 = arith.constant 0 : index
    %0 = memref.load %arg1[%c0] : memref<3xf32, #tpu.memory_space<smem>>
    %c1 = arith.constant 1 : index
    %1 = memref.load %arg1[%c1] : memref<3xf32, #tpu.memory_space<smem>>
    %c2 = arith.constant 2 : index
    %2 = memref.load %arg1[%c2] : memref<3xf32, #tpu.memory_space<smem>>
    %c0_0 = arith.constant 0 : index
    %c0_1 = arith.constant 0 : index
    %c0_2 = arith.constant 0 : index
    %3 = vector.load %arg2[%c0_0, %c0_1, %c0_2] : memref<2x8x512xf32, #tpu.memory_space<vmem>>, vector<1x8x512xf32>
    %4 = vector.shape_cast %3 : vector<1x8x512xf32> to vector<8x512xf32>
    %c1_3 = arith.constant 1 : index
    %c0_4 = arith.constant 0 : index
    %c0_5 = arith.constant 0 : index
    %5 = vector.load %arg2[%c1_3, %c0_4, %c0_5] : memref<2x8x512xf32, #tpu.memory_space<vmem>>, vector<1x8x512xf32>
    %6 = vector.shape_cast %5 : vector<1x8x512xf32> to vector<8x512xf32>
    %7 = vector.broadcast %0 : f32 to vector<8x512xf32>
    %8 = arith.mulf %4, %7 : vector<8x512xf32>
    %9 = vector.broadcast %1 : f32 to vector<8x512xf32>
    %10 = arith.mulf %6, %9 : vector<8x512xf32>
    %11 = arith.addf %8, %10 : vector<8x512xf32>
    %12 = vector.broadcast %2 : f32 to vector<8x512xf32>
    %13 = arith.addf %11, %12 : vector<8x512xf32>
    %c0_6 = arith.constant 0 : index
    %c0_7 = arith.constant 0 : index
    %14 = vector.load %arg3[%c0_6, %c0_7] : memref<8x512xf32, #tpu.memory_space<vmem>>, vector<8x512xf32>
    tpu.vector_store %arg3[%c0_6, %c0_7], %13 {strides = array<i32>} : memref<8x512xf32, #tpu.memory_space<vmem>>, vector<8x512xf32>,
    return
  }
  func.func @transform_0(%arg0: i32) -> i32 {
    %c0_i32 = arith.constant 0 : i32
    %c0_i32_0 = arith.constant 0 : i32
    return %c0_i32 : i32
  }
  func.func @transform_1(%arg0: i32) -> (i32, i32, i32) {
    %c0_i32 = arith.constant 0 : i32
    %c0_i32_0 = arith.constant 0 : i32
    %c0_i32_1 = arith.constant 0 : i32
    return %c0_i32, %arg0, %c0_i32_0 : i32, i32, i32
  }
  func.func @transform_2(%arg0: i32) -> (i32, i32) {
    %c0_i32 = arith.constant 0 : i32
    %c0_i32_0 = arith.constant 0 : i32
    return %arg0, %c0_i32 : i32, i32
  }
}

</mosaic_0001>

<bundles_post_ra>
// kernel: tpu_custom_call.1
= control target key start
LH: loop header
LB: loop body
LE: loop exit
PB: predicated region body
PF: predicated region fallthrough
CT: control target
= control target key end

     0   :  { %7 = vsyncpa [#allocation5], 0  ;;  %s196_s0 = inlined_call_operand.hbm [shape: f32[3], index: 0, kind: input, shape index: {}]   ;;  %s197_s1 = inlined_call_operand.hbm [shape: f32[2,8,512], index: 1, kind: input, shape index: {}]   ;;  %s198_s2 = inlined_call_operand.hbm [shape: f32[8,512], index: 2, kind: output, shape index: {}]  }
   0x1   :  { %8 = vsyncpa [#allocation3], 0 }
   0x2   :  { %9 = vsyncpa [#allocation4], 0  ;;  %s15_s11 = sshll.u32 %s196_s0, 4  ;;  %s23_s14 = sshll.u32 %s197_s1, 4  ;;  %s16_s11 = int_to_ptr.hbm [resolvable:$true] %s15_s11  ;;  %s24_s14 = int_to_ptr.hbm [resolvable:$true] %s23_s14 }
   0x3   :  { %s167_s15 = smov [#allocation2]   ;;  %s168_s16 = smov [#allocation6]  }
   0x4   :  { %18 = dma.hbm_to_smem %s16_s11, 16, %s167_s15, [#allocation5]  }
   0x5   :  { %s25_s17 = sshll.u32 %s168_s16, 4  ;;  %s169_s18 = smov 512   ;;  %s26_s17 = int_to_ptr.vmem [resolvable:$true] %s25_s17 }
   0x6   :  { %s170_s19 = smov 32  }
   0x7   :  { %31 = dma.hbm_to_vmem [thread:$0]  %s24_s14, 1024, %s26_s17, [#allocation3], %s169_s18, %s169_s18, %s170_s19  }
   0x8   :  { %161 = dma.done.wait [#allocation5], 16  }
   0x9   :  { %162 = vsyncadd [#allocation5], 4294967280 }
   0xa   :  { %163 = dma.done.wait [#allocation3], 1024  }
   0xb   :  { %164 = vsyncadd [#allocation3], 4294966272 }
   0xc   :  { %40 = sfence }
   0xd   :  { %s41_s0 = sld [smem:[#allocation2]]  ;;  %v44_v0 = vld [vmem:[#allocation6] sm:$0xff]  ;;  %v45_v1 = vld [vmem:[#allocation6 + $0x8] sm:$0xff]  ;;  %v46_v2 = vld [vmem:[#allocation6 + $0x10] sm:$0xff]  ;;  %s171_s1 = smov [#allocation7]  }
   0xe   :  { %s94_s20 = sld [smem:[#allocation2 + $0x1]]  ;;  %v49_v3 = vld [vmem:[#allocation6 + $0x20] sm:$0xff]  ;;  %v50_v4 = vld [vmem:[#allocation6 + $0x28] sm:$0xff]  ;;  %v51_v5 = vld [vmem:[#allocation6 + $0x30] sm:$0xff]  ;;  %s81_s22 = sshll.u32 %s171_s1, 4  ;;  %s82_s22 = int_to_ptr.vmem [resolvable:$true] %s81_s22 }
   0xf   :  { %s95_s21 = sld [smem:[#allocation2 + $0x2]]  ;;  %v47_v7 = vld [vmem:[#allocation6 + $0x18] sm:$0xff]  ;;  %s83_s25 = sshll.u32 %s198_s2, 4  ;;  %s84_s25 = int_to_ptr.hbm [resolvable:$true] %s83_s25 }
  0x10   :  { %v52_v8 = vld [vmem:[#allocation6 + $0x38] sm:$0xff] }
  0x13   :  { %v53_v6 = vstv %s41_s0 }
  0x14   :  { %v54_v9 = vmul.f32 %v53_v6, %v44_v0  ;;  %v58_v10 = vstv %s94_s20  ;;  %v55_v11 = vmul.f32 %v53_v6, %v45_v1  ;;  %v56_v12 = vmul.f32 %v53_v6, %v46_v2 }
  0x15   :  { %v59_v13 = vmul.f32 %v58_v10, %v49_v3  ;;  %v60_v14 = vmul.f32 %v58_v10, %v50_v4  ;;  %v61_v15 = vmul.f32 %v58_v10, %v51_v5  ;;  %v67_v16 = vstv %s95_s21 }
  0x16   :  { %v57_v17 = vmul.f32 %v53_v6, %v47_v7  ;;  %v62_v18 = vmul.f32 %v58_v10, %v52_v8 }
  0x17   :  { %v63_v19 = vadd.f32 %v59_v13, %v54_v9  ;;  %v64_v20 = vadd.f32 %v60_v14, %v55_v11  ;;  %v65_v21 = vadd.f32 %v61_v15, %v56_v12 }
  0x18   :  { %v66_v22 = vadd.f32 %v62_v18, %v57_v17 }
  0x19   :  { %v68_v23 = vadd.f32 %v67_v16, %v63_v19  ;;  %v69_v24 = vadd.f32 %v67_v16, %v64_v20  ;;  %v70_v25 = vadd.f32 %v67_v16, %v65_v21 }
  0x1a   :  { %v71_v26 = vadd.f32 %v67_v16, %v66_v22 }
  0x1b   :  { %72 = vst [vmem:[#allocation7] sm:$0xff] %v68_v23 }
  0x1c   :  { %73 = vst [vmem:[#allocation7 + $0x8] sm:$0xff] %v69_v24 }
  0x1d   :  { %74 = vst [vmem:[#allocation7 + $0x10] sm:$0xff] %v70_v25 }
  0x1e   :  { %75 = vst [vmem:[#allocation7 + $0x18] sm:$0xff] %v71_v26 }
  0x1f   :  { %86 = dma.vmem_to_hbm [thread:$0]  %s82_s22, 512, %s84_s25, [#allocation4]  }
  0x20   :  { %165 = dma.done.wait [#allocation4], 512  }
  0x21   :  { %166 = vsyncadd [#allocation4], 4294966784 }
  0x22   :  { %91 = vsyncpa [#allocation3], 1 }
  0x23   :  { %92 = vsyncpa [#allocation4], 1 }
  0x24   :  { %93 = vsyncpa [#allocation5], 1 }

</bundles_post_ra>
